<compile_context>
chip_gen: v6e
topology: v6e:2x2x1
jax: 0.10.0
libtpu: 0.0.40
codegen_flags: <defaults>
</compile_context>

<pallas_src>
import functools

import jax
import jax.numpy as jnp
from jax.experimental import pallas as pl
from jax.experimental.pallas import tpu as pltpu


def _convlr_kernel(p_ref, w_ref, b_ref, o_ref):
    """Single fused GEMM for one M-tile.

    p_ref : (TM, Kp)  im2col patches (bf16)
    w_ref : (Kp, Cp)  folded weight  W_eff = Wres + Wu @ Wv  (bf16, resident)
    b_ref : (1,  Cp)  bias (f32, resident)
    o_ref : (TM, Cp)  output tile (f32)
    """
    out = jnp.dot(p_ref[...], w_ref[...], preferred_element_type=jnp.float32)
    out = out + b_ref[...]
    o_ref[...] = out.astype(o_ref.dtype)


def _round_up(x, n):
    return ((x + n - 1) // n) * n


def _im2col(x, kh, kw, stride, padding):
    """x: (N, Cin, H, W) -> patches (N*OH*OW, Cin*kh*kw), plus (OH, OW).

    Column ordering is cin-major, then kh, then kw — matching the OIHW weight
    reshape used below.
    """
    n, cin, h, w = x.shape
    oh = (h + 2 * padding - kh) // stride + 1
    ow = (w + 2 * padding - kw) // stride + 1
    xp = jnp.pad(x, ((0, 0), (0, 0), (padding, padding), (padding, padding)))
    cols = []
    for i in range(kh):
        for j in range(kw):
            cols.append(
                xp[:, :, i:i + stride * (oh - 1) + 1:stride,
                          j:j + stride * (ow - 1) + 1:stride]
            )  # (N, Cin, OH, OW)
    cols = jnp.stack(cols, axis=2)                     # (N, Cin, kh*kw, OH, OW)
    k = cin * kh * kw
    patches = cols.reshape(n, k, oh, ow)               # (N, K, OH, OW)
    patches = patches.transpose(0, 2, 3, 1)            # (N, OH, OW, K)
    return patches.reshape(n * oh * ow, k), oh, ow


def _pick_tm(m, k_pad, c_pad, budget_bytes=24 * 1024 * 1024):
    """Pick an M tile: big (target 512), multiple of 16 (bf16 sublane packing),
    within a VMEM budget (double-buffered patches/outputs + resident W_eff),
    and giving >= 2 grid steps when M permits (v7x has 2 TensorCores)."""
    def need(t):
        return (2 * t * k_pad * 2          # patches, bf16, double-buffered
                + 2 * t * c_pad * 4        # output, f32, double-buffered
                + 2 * k_pad * c_pad * 2    # W_eff (bf16)
                + 2 * c_pad * 4)           # bias  (f32)
    tm = 512
    while tm > 16 and need(tm) > budget_bytes:
        tm //= 2
    if m <= tm:
        tm = max(16, _round_up(pl.cdiv(m, 2), 16))
    return tm


@functools.partial(jax.jit, static_argnames=("stride", "padding"))
def convlr_forward(x, wu, wv, wres, bias, *, stride, padding):
    """ConvLR forward.  x: (N, Cin, H, W) NCHW.  Returns (N, Cout, OH, OW)."""
    n, cin, h, w = x.shape
    r = wu.shape[0]
    cout = wres.shape[0]
    kh, kw = wu.shape[2], wu.shape[3]

    patches, oh, ow = _im2col(x, kh, kw, stride, padding)
    m, k = patches.shape

    # ---- fold low-rank path into residual weight (identical math, f32) ----
    wu_m = wu.reshape(r, k).T.astype(jnp.float32)        # (K, R)
    wv_m = wv.reshape(cout, r).T.astype(jnp.float32)     # (R, C)
    wres_m = wres.reshape(cout, k).T.astype(jnp.float32)  # (K, C)
    w_eff = wres_m + wu_m @ wv_m                         # (K, C)

    # ---- pad K and Cout to lane multiples (128) ----
    k_pad = _round_up(k, 128)
    c_pad = _round_up(cout, 128)
    if k_pad != k:
        patches = jnp.pad(patches, ((0, 0), (0, k_pad - k)))
        w_eff = jnp.pad(w_eff, ((0, k_pad - k), (0, 0)))
    if c_pad != cout:
        w_eff = jnp.pad(w_eff, ((0, 0), (0, c_pad - cout)))
    b_m = jnp.pad(bias.astype(jnp.float32), (0, c_pad - cout)).reshape(1, c_pad)

    # ---- pick TM from VMEM budget; pad M up to a tile multiple ----
    tm = _pick_tm(m, k_pad, c_pad)
    m_pad = _round_up(m, tm)
    if m_pad != m:
        patches = jnp.pad(patches, ((0, m_pad - m), (0, 0)))

    # bf16 compute inputs (f32 accumulation happens inside the kernel).
    patches = patches.astype(jnp.bfloat16)
    w_eff = w_eff.astype(jnp.bfloat16)

    grid = (m_pad // tm,)
    cost = pl.CostEstimate(
        flops=2 * m_pad * k_pad * c_pad,
        transcendentals=0,
        bytes_accessed=(m_pad * k_pad * 2 + k_pad * c_pad * 2
                        + m_pad * c_pad * 4 + c_pad * 4),
    )

    out = pl.pallas_call(
        _convlr_kernel,
        out_shape=jax.ShapeDtypeStruct((m_pad, c_pad), jnp.float32),
        grid_spec=pltpu.PrefetchScalarGridSpec(
            num_scalar_prefetch=0,
            grid=grid,
            in_specs=[
                pl.BlockSpec((tm, k_pad), lambda i: (i, 0)),      # patches tile
                pl.BlockSpec((k_pad, c_pad), lambda i: (0, 0)),   # W_eff (resident)
                pl.BlockSpec((1, c_pad), lambda i: (0, 0)),       # bias  (resident)
            ],
            out_specs=pl.BlockSpec((tm, c_pad), lambda i: (i, 0)),
        ),
        compiler_params=pltpu.CompilerParams(
            dimension_semantics=("parallel",),
            vmem_limit_bytes=28 * 1024 * 1024,   # safe under v7x 32 MiB scoped default
        ),
        cost_estimate=cost,
    )(patches, w_eff, b_m)

    out = out[:m, :cout]                                          # drop M/C padding
    out = out.reshape(n, oh, ow, cout).transpose(0, 3, 1, 2)      # back to NCHW
    return out.astype(x.dtype)


def _reference_forward(x, wu, wv, wres, bias, *, stride, padding):
    """Pure-JAX reference matching the PyTorch module semantics (f32)."""
    dn = ("NCHW", "OIHW", "NCHW")
    u = jax.lax.conv_general_dilated(
        x, wu, (stride, stride), [(padding, padding)] * 2, dimension_numbers=dn)
    v = jax.lax.conv_general_dilated(
        u, wv, (1, 1), [(0, 0)] * 2, dimension_numbers=dn)
    v = v + bias.reshape(1, -1, 1, 1)
    res = jax.lax.conv_general_dilated(
        x, wres, (stride, stride), [(padding, padding)] * 2, dimension_numbers=dn)
    return v + res


if __name__ == "__main__":
    # Module config (mirrors ConvLR.__init__).
    in_planes, out_planes = 8, 16
    kernel_size, stride, padding = 3, 1, 1
    rank_ratio = 0.25
    sliced_rank = int(min(in_planes, out_planes) * rank_ratio)  # = 2

    # Small deterministic inputs / params.
    key = jax.random.PRNGKey(0)
    kx, ku, kv, kr, kb = jax.random.split(key, 5)
    N, H, W = 2, 8, 8
    x = jax.random.normal(kx, (N, in_planes, H, W), dtype=jnp.float32)
    wu = 0.1 * jax.random.normal(
        ku, (sliced_rank, in_planes, kernel_size, kernel_size), dtype=jnp.float32)
    wv = 0.1 * jax.random.normal(
        kv, (out_planes, sliced_rank, 1, 1), dtype=jnp.float32)
    wres = 0.1 * jax.random.normal(
        kr, (out_planes, in_planes, kernel_size, kernel_size), dtype=jnp.float32)
    bias = 0.1 * jax.random.normal(kb, (out_planes,), dtype=jnp.float32)

    out = convlr_forward(x, wu, wv, wres, bias, stride=stride, padding=padding)
    out = jax.block_until_ready(out)

    ref = _reference_forward(x, wu, wv, wres, bias, stride=stride, padding=padding)
    ref = jax.block_until_ready(ref)

    assert out.shape == (N, out_planes, H, W), out.shape
    # bf16 compute path with f32 accumulation: tolerance ~5e-2 absolute.
    max_err = float(jnp.max(jnp.abs(out - ref)))
    assert max_err < 5e-2, f"mismatch vs reference: max abs err = {max_err}"

    print("KERNEL_OK")
</pallas_src>

<mosaic_0001>
module attributes {stable_mosaic.version = 11 : i64} {
  func.func @_convlr_kernel(%arg0: i32, %arg1: memref<64x128xbf16, #tpu.memory_space<vmem>>, %arg2: memref<128x128xbf16, #tpu.memory_space<vmem>>, %arg3: memref<1x128xf32, #tpu.memory_space<vmem>>, %arg4: memref<64x128xf32, #tpu.memory_space<vmem>>) attributes {dimension_semantics = [#tpu.dimension_semantics<parallel>], iteration_bounds = array<i64: 2>, scalar_prefetch = 0 : i64, scratch_operands = 0 : i64, tpu.core_type = #tpu.core_type<tc>, window_params = [{transform_indices = @transform_0, window_bounds = array<i64: 64, 128>}, {pipeline_mode = #tpu.pipeline_mode<synchronous>, transform_indices = @transform_1, window_bounds = array<i64: 128, 128>}, {pipeline_mode = #tpu.pipeline_mode<synchronous>, transform_indices = @transform_2, window_bounds = array<i64: 1, 128>}, {transform_indices = @transform_3, window_bounds = array<i64: 64, 128>}]} {
    %c0 = arith.constant 0 : index
    %c0_0 = arith.constant 0 : index
    %0 = vector.load %arg1[%c0, %c0_0] : memref<64x128xbf16, #tpu.memory_space<vmem>>, vector<64x128xbf16>
    %c0_1 = arith.constant 0 : index
    %c0_2 = arith.constant 0 : index
    %1 = vector.load %arg2[%c0_1, %c0_2] : memref<128x128xbf16, #tpu.memory_space<vmem>>, vector<128x128xbf16>
    %cst = arith.constant dense<0.000000e+00> : vector<64x128xf32>
    %2 = tpu.matmul %0, %1, %cst {dimension_numbers = #tpu.dot_dimension_numbers<[1], [0], [0], [1], [0, 0, 1, 1], [], []>} : vector<64x128xbf16>, vector<128x128xbf16>, vector<64x128xf32> -> vector<64x128xf32>
    %c0_3 = arith.constant 0 : index
    %c0_4 = arith.constant 0 : index
    %3 = vector.load %arg3[%c0_3, %c0_4] : memref<1x128xf32, #tpu.memory_space<vmem>>, vector<1x128xf32>
    %4 = vector.broadcast %3 : vector<1x128xf32> to vector<64x128xf32>
    %5 = arith.addf %2, %4 : vector<64x128xf32>
    %c0_5 = arith.constant 0 : index
    %c0_6 = arith.constant 0 : index
    %6 = vector.load %arg4[%c0_5, %c0_6] : memref<64x128xf32, #tpu.memory_space<vmem>>, vector<64x128xf32>
    tpu.vector_store %arg4[%c0_5, %c0_6], %5 {strides = array<i32>} : memref<64x128xf32, #tpu.memory_space<vmem>>, vector<64x128xf32>,
    return
  }
  func.func @transform_0(%arg0: i32) -> (i32, i32) {
    %c0_i32 = arith.constant 0 : i32
    %c0_i32_0 = arith.constant 0 : i32
    return %arg0, %c0_i32 : i32, i32
  }
  func.func @transform_1(%arg0: i32) -> (i32, i32) {
    %c0_i32 = arith.constant 0 : i32
    %c0_i32_0 = arith.constant 0 : i32
    %c0_i32_1 = arith.constant 0 : i32
    return %c0_i32, %c0_i32_0 : i32, i32
  }
  func.func @transform_2(%arg0: i32) -> (i32, i32) {
    %c0_i32 = arith.constant 0 : i32
    %c0_i32_0 = arith.constant 0 : i32
    %c0_i32_1 = arith.constant 0 : i32
    return %c0_i32, %c0_i32_0 : i32, i32
  }
  func.func @transform_3(%arg0: i32) -> (i32, i32) {
    %c0_i32 = arith.constant 0 : i32
    %c0_i32_0 = arith.constant 0 : i32
    return %arg0, %c0_i32 : i32, i32
  }
}

</mosaic_0001>

<bundles_post_ra>
// kernel: convlr_forward.1
= control target key start
LH: loop header
LB: loop body
LE: loop exit
PB: predicated region body
PF: predicated region fallthrough
CT: control target
= control target key end

     0   :  { %8 = vsyncpa [#allocation3], 0  ;;  %s779_s0 = inlined_call_operand.vmem [shape: bf16[128,128], index: 0, kind: input, shape index: {}]   ;;  %s780_s1 = inlined_call_operand.vmem [shape: bf16[128,128], index: 1, kind: input, shape index: {}]   ;;  %s781_s2 = inlined_call_operand.vmem [shape: f32[1,128], index: 2, kind: input, shape index: {}]   ;;  %s782_s3 = inlined_call_operand.hbm [shape: f32[128,128], index: 3, kind: output, shape index: {}]  }
   0x1   :  { %10 = vsyncpa [#allocation3 + $0x1], 0  ;;  %s641_s12 = smov 0   ;;  %s643_s13 = smov 0  }
   0x2   :  { %s645_s14 = smov 0   ;;  %s647_s15 = smov 0  }
   0x3 LB: > { %s662_s16 = sadd.s32 4294967295, %s616_s15   ;;  %s425_s17 = sadd.s32 4294967294, %s616_s15   ;;  %s616_s15 = sphi %s647_s15, %s788_s15   ;;  %s612_s14 = sphi %s645_s14, %s787_s14   ;;  %s608_s13 = sphi %s643_s13, %s786_s13   ;;  %s604_s12 = sphi %s641_s12, %s785_s12  }
   0x4   : > { %s666_s18 = sadd.s32 1, %s616_s15   ;;  %s91_s19 = sadd.s32 1, %s612_s14 }
   0x5   : > { %s88_s20 = ssub.s32 %s616_s15, %s666_s18  ;;  %p101_p0 = scmp.ne.s32.totalorder %s612_s14, %s608_s13 }
   0x6   : > { %p89_p1 = scmp.eq.s32.totalorder %s88_s20, 0  ;;  %p102_p2 = scmp.eq.s32.totalorder %s662_s16, 1 }
   0x7   : > { %p107_p3 = scmp.ne.s32.totalorder %s608_s13, %s604_s12  ;;  %p108_p4 = scmp.eq.s32.totalorder %s425_s17, 1 }
   0x8   : > { %s677_s21 = scalar_select %p89_p1, %s612_s14, %s91_s19  }
   0x9   : > { %p679_p5 = por %p102_p2, %p101_p0  ;;  %p683_p6 = por %p108_p4, %p107_p3 }
   0xa   : > { %p428_p7 = scmp.ge.s32.totalorder %s616_s15, 1  ;;  %p141_p8 = scmp.lt.s32.totalorder %s616_s15, 3 }
   0xc   : > { %p142_p9 = pnand %p428_p7, %p141_p8 }
   0xd   : > { %s430_s26 = sshll.u32 (!%p142_p9), %s662_s16, 3  ;;  %s162_s27 = sand.u32 (!%p142_p9), 1, %s608_s13  }
   0xe   : > { %145 = sbr.rel (%p142_p9) target bundleno = 267 (0x10b), region = 32  ;;  %p166_p10 = scmp.lt.s32.totalorder (!%p142_p9), %s430_s26, 15 }
   0xf   : > { %s429_s28 = sshll.u32 (!%p142_p9), %s162_s27, 6  ;;  %s450_s5 = sshll.u32 (!%p142_p9), %s662_s16, 10 }
  0x10   : > { %s733_s9 = scalar_lea.hbm (!%p142_p9), %s782_s3, %s450_s5  ;;  %s739_s16 = scalar_lea.sflag (!%p142_p9), [#allocation3], %s162_s27 }
  0x11   : > { %s618_s11 = smov (!%p142_p9), [#allocation2]  }
  0x12   : > { %s560_s17 = sshll.u32 (!%p142_p9), %s618_s11, 4  ;;  %s561_s17 = int_to_ptr.vmem [resolvable:$false] %s560_s17 }
  0x13   : > { %v544_v0 = vld [vmem:[%s780_s1 + $0x38] sm:$0xff]   ;;  %v545_v1 = vld [vmem:[%s780_s1 + $0x30] sm:$0xff]   ;;  %s790_s26 = smov (!%p166_p10, %s430_s26), 15  ;;  %v546_v2 = vld [vmem:[%s780_s1 + $0x28] sm:$0xff]   ;;  %s562_s19 = scalar_lea.vmem %s561_s17, 2048 }
  0x14   : > { %463 = vmatprep.subr.bf16.mxu0 %v544_v0  ;;  %487 = vmatprep.subr.bf16.mxu1 %v544_v0  ;;  %s431_s4 = sshll.u32 %s790_s26, 2  ;;  %v547_v3 = vld [vmem:[%s780_s1 + $0x20] sm:$0xff]   ;;  %v548_v6 = vld [vmem:[%s780_s1 + $0x18] sm:$0xff]   ;;  %v549_v7 = vld [vmem:[%s780_s1 + $0x10] sm:$0xff]  }
  0x15   : > { %464 = vmatpush3.bf16.msra.mxu0 %v544_v0  ;;  %495 = vmatpush3.bf16.msra.mxu1 %v544_v0  ;;  %s702_s7 = scalar_lea.vmem %s779_s0, %s431_s4  ;;  %v550_v8 = vld [vmem:[%s780_s1 + $0x8] sm:$0xff]   ;;  %v551_v9 = vld [vmem:[%s780_s1] sm:$0xff]   ;;  %s164_s4 = scalar_lea.vmem [#allocation2], %s429_s28 }
  0x16   : > { %465 = vmatprep.subr.bf16.mxu0 %v545_v1  ;;  %488 = vmatprep.subr.bf16.mxu1 %v545_v1  ;;  %v552_v4 = vld [vmem:[%s702_s7] sm:$0xff]   ;;  %v553_v5 = vld [vmem:[%s702_s7 + $0x10] sm:$0xff]   ;;  %v554_v10 = vld [vmem:[%s702_s7 + $0x8] sm:$0xff]   ;;  %s363_s6 = sshll.u32 %s164_s4, 4  ;;  %s735_s6 = int_to_ptr.vmem [resolvable:$true] %s363_s6 }
  0x17   : > { %479 = vmatprep.mubr.bf16.mxu0 %v552_v4  ;;  %483 = vmatprep.mubr.bf16.mxu1 %v553_v5  ;;  %v555_v11 = vld [vmem:[%s702_s7 + $0x18] sm:$0xff]   ;;  %v432_v12 = vld [vmem:[%s781_s2] ss:$0 sm:$0xff]  ;;  %s556_s10 = scalar_lea.vmem %s735_s6, 1024  ;;  %p563_p0 = scmp.lt.s32.totalorder %s735_s6, %s561_s17 }
  0x18   : > { %p557_p11 = scmp.ne.s32.totalorder %s735_s6, %s556_s10  ;;  %p564_p1 = scmp.lt.s32.totalorder %s562_s19, %s556_s10 }
  0x19   : > { %466 = vmatpush3.bf16.msra.mxu0 %v545_v1  ;;  %496 = vmatpush3.bf16.msra.mxu1 %v545_v1 }
  0x1a   : > { %467 = vmatprep.subr.bf16.mxu0 %v546_v2  ;;  %489 = vmatprep.subr.bf16.mxu1 %v546_v2  ;;  %p558_p12 = pnand %p557_p11, %p679_p5  ;;  %p565_p2 = por %p564_p1, %p563_p0 }
  0x1c   : > { %p559_p13 = pneg %p558_p12 }
  0x1d   : > { %468 = vmatpush3.bf16.msra.mxu0 %v546_v2  ;;  %497 = vmatpush3.bf16.msra.mxu1 %v546_v2 }
  0x1e   : > { %469 = vmatprep.subr.bf16.mxu0 %v547_v3  ;;  %490 = vmatprep.subr.bf16.mxu1 %v547_v3  ;;  %p566_p3 = pnand %p565_p2, %p559_p13 }
  0x21   : > { %470 = vmatpush3.bf16.msra.mxu0 %v547_v3  ;;  %498 = vmatpush3.bf16.msra.mxu1 %v547_v3 }
  0x22   : > { %471 = vmatprep.subr.bf16.mxu0 %v548_v6  ;;  %491 = vmatprep.subr.bf16.mxu1 %v548_v6 }
  0x25   : > { %472 = vmatpush3.bf16.msra.mxu0 %v548_v6  ;;  %499 = vmatpush3.bf16.msra.mxu1 %v548_v6 }
  0x26   : > { %473 = vmatprep.subr.bf16.mxu0 %v549_v7  ;;  %492 = vmatprep.subr.bf16.mxu1 %v549_v7 }
  0x29   : > { %474 = vmatpush3.bf16.msra.mxu0 %v549_v7  ;;  %500 = vmatpush3.bf16.msra.mxu1 %v549_v7 }
  0x2a   : > { %475 = vmatprep.subr.bf16.mxu0 %v550_v8  ;;  %493 = vmatprep.subr.bf16.mxu1 %v550_v8 }
  0x2d   : > { %476 = vmatpush3.bf16.msra.mxu0 %v550_v8  ;;  %501 = vmatpush3.bf16.msra.mxu1 %v550_v8 }
  0x2e   : > { %477 = vmatprep.subr.bf16.mxu0 %v551_v9  ;;  %494 = vmatprep.subr.bf16.mxu1 %v551_v9 }
  0x31   : > { %478 = vmatpush3.bf16.msra.mxu0 %v551_v9  ;;  %502 = vmatpush3.bf16.msra.mxu1 %v551_v9 }
  0x34   : > { %480 = vmatmul.mubr.bf16.vlgmr.msra.gmra.mxu0 %v554_v10  ;;  %484 = vmatmul.mubr.bf16.vlgmr.msra.gmra.mxu1 %v555_v11 }
  0xf4   : > { %v481_v13 = vpop.f32.mrf.mxu0  ;;  %v485_v14 = vpop.f32.mrf.mxu1 }
  0xf5   : > { %v319_v15 = vadd.f32 %v481_v13, %v432_v12  ;;  %v335_v16 = vadd.f32 %v485_v14, %v432_v12 }
  0xf6   : > { %v310_v17 = vpop.f32.mrf.mxu0  ;;  %v326_v18 = vpop.f32.mrf.mxu1 }
  0xf7   : > { %343 = vst [vmem:[%s164_s4 + $0x10] sm:$0xff] %v319_v15  ;;  %347 = vst [vmem:[%s164_s4 + $0x30] sm:$0xff] %v335_v16  ;;  %v311_v19 = vadd.f32 %v432_v12, %v310_v17  ;;  %v327_v20 = vadd.f32 %v432_v12, %v326_v18 }
  0xf8   : > { %v482_v21 = vpop.f32.mrf.mxu0  ;;  %v486_v22 = vpop.f32.mrf.mxu1 }
  0xf9   : > { %341 = vst [vmem:[%s164_s4] sm:$0xff] %v311_v19  ;;  %345 = vst [vmem:[%s164_s4 + $0x20] sm:$0xff] %v327_v20  ;;  %v322_v23 = vadd.f32 %v482_v21, %v432_v12  ;;  %v338_v24 = vadd.f32 %v486_v22, %v432_v12 }
  0xfa   : > { %v313_v25 = vpop.f32.mrf.mxu0  ;;  %v329_v26 = vpop.f32.mrf.mxu1 }
  0xfb   : > { %344 = vst [vmem:[%s164_s4 + $0x18] sm:$0xff] %v322_v23  ;;  %348 = vst [vmem:[%s164_s4 + $0x38] sm:$0xff] %v338_v24  ;;  %v314_v27 = vadd.f32 %v432_v12, %v313_v25  ;;  %v330_v28 = vadd.f32 %v432_v12, %v329_v26 }
  0xfd   : > { %342 = vst [vmem:[%s164_s4 + $0x8] sm:$0xff] %v314_v27  ;;  %346 = vst [vmem:[%s164_s4 + $0x28] sm:$0xff] %v330_v28 }
  0xfe   : > { %569 = shalt.err (!%p566_p3)
}
  0xff   : > { %s570_s20 = scalar_lea.hbm %s733_s9, 1024  ;;  %s574_s26 = scalar_lea.hbm %s782_s3, 2048 }
 0x100   : > { %p571_p4 = scmp.ne.s32.totalorder %s733_s9, %s570_s20  ;;  %p575_p9 = scmp.lt.s32.totalorder %s733_s9, %s782_s3 }
 0x101   : > { %p576_p10 = scmp.lt.s32.totalorder %s574_s26, %s570_s20 }
 0x102   : > { %p572_p7 = pnand %p571_p4, %p679_p5 }
 0x103   : > { %p577_p11 = por %p576_p10, %p575_p9 }
 0x104   : > { %p573_p8 = pneg %p572_p7 }
 0x106   : > { %p578_p12 = pnand %p577_p11, %p573_p8 }
 0x108   : > { %581 = shalt.err (!%p578_p12)
}
 0x109   : > { %s619_s29 = smov 128   ;;  %s620_s30 = smov 8  }
 0x10a   : > { %503 = dma.vmem_to_hbm [thread:$0]  (%p679_p5), %s735_s6, 1024, %s733_s9, %s739_s16, %s619_s29, %s619_s29, %s620_s30  }
 0x10b PF: > { %p509_p13 = scmp.ge.s32.totalorder %s616_s15, 2  ;;  %s378_s4 = sand.u32 1, %s604_s12  }
 0x10c   : > { %s379_s5 = scalar_lea.sflag [#allocation3], %s378_s4 }
 0x10d   : > { %p506_p0 = pnand %p509_p13, %p683_p6 }
 0x10f   : > { %p507_p1 = pneg %p506_p0 }
 0x111   : > { %599 = dma.done.wait (%p507_p1), %s379_s5, 1024  }
 0x112   : > { %601 = vsyncadd (%p507_p1), %s379_s5, 4294966272  ;;  %p13_p2 = scmp.ge.s32.totalorder %s666_s18, 4   ;;  %s785_s12 = smov %s608_s13 }
 0x113   : > { %s786_s13 = smov %s612_s14  ;;  %s787_s14 = smov %s677_s21 }
 0x114   : > { %s788_s15 = smov %s666_s18  ;;  %15 = sbr.rel (!%p13_p2) target bundleno = 3 (0x3), region = 67 }
 0x119   :  { %384 = vsyncpa [#allocation3], 1 }
 0x11a   :  { %386 = vsyncpa [#allocation3 + $0x1], 1 }

</bundles_post_ra>
